<compile_context>
chip_gen: v6e
topology: v6e:2x2x1
jax: 0.10.0
libtpu: 0.0.40
codegen_flags: <defaults>
</compile_context>

<pallas_src>
import jax
import jax.numpy as jnp
from jax.experimental import pallas as pl
from jax.experimental.pallas import tpu as pltpu


def _round_up(n: int, m: int) -> int:
    return ((n + m - 1) // m) * m


def _make_mlp_kernel(n_linear: int):
    """Kernel for an MLP with `n_linear` Linear layers, computed transposed.

    Ref layout: (x_ref, w0, b0, w1, b1, ..., w_{n-1}, b_{n-1}, out_ref) where
      x_ref : (TILE_B, in_dim)              (row-major activation tile)
      w_i   : (out_i, in_i)                 (PyTorch nn.Linear layout)
      b_i   : (out_i, 1)                    (broadcasts over the lane axis)
      out   : (out_dim, TILE_B)             (lane-dense store)
    ReLU after every layer except the last.
    """

    def kernel(*refs):
        x_ref = refs[0]
        o_ref = refs[-1]

        # Layer 0: contract the feature axis of w0 (out0, in) with the feature
        # axis of x (TILE_B, in) -> (out0, TILE_B).  This is the q @ k.T pattern:
        # the MXU folds the transpose, and the activation stays lane-dense
        # (features on sublanes, batch on lanes) for the rest of the chain.
        w0 = refs[1][...]
        b0 = refs[2][...]
        h = jax.lax.dot_general(
            w0,
            x_ref[...].astype(w0.dtype),
            dimension_numbers=(((1,), (1,)), ((), ())),
            preferred_element_type=jnp.float32,
        ) + b0
        if n_linear > 1:
            h = jnp.maximum(h, 0.0)  # ReLU on the VPU

        for i in range(1, n_linear):
            w = refs[1 + 2 * i][...]
            b = refs[2 + 2 * i][...]
            h = jnp.dot(w, h.astype(w.dtype),
                        preferred_element_type=jnp.float32) + b
            if i < n_linear - 1:
                h = jnp.maximum(h, 0.0)

        o_ref[...] = h.astype(o_ref.dtype)

    return kernel


def model_waypoint_forward(x, params, *, tile_b=1024, compute_dtype=jnp.float32):
    """Run the MLP forward pass with a single pallas_call.

    Args:
      x: (batch, input_dim) float32.
      params: list of (W, b) with W: (out_features, in_features), b: (out_features,)
              -- exactly the PyTorch nn.Linear layout.
      tile_b: requested batch tile (rows per grid step).  Large (1K-8K) amortizes
              the ~0.35us per-step overhead; small batches collapse to one step.
      compute_dtype: jnp.float32 (default) or jnp.bfloat16 for x/weights.
              Accumulation is always f32 (preferred_element_type).
    Returns:
      (batch, output_dim) float32.
    """
    batch, in_dim = x.shape
    n_linear = len(params)
    out_dim = params[-1][0].shape[0]

    # --- batch tiling / padding -------------------------------------------------
    if batch <= tile_b:
        tile_b = max(_round_up(batch, 8), 8)   # single grid step, full extent
        padded_batch = tile_b
    else:
        tile_b = _round_up(tile_b, 128)        # keep lane-dense output block legal
        padded_batch = _round_up(batch, tile_b)
    grid = (padded_batch // tile_b,)

    x_in = x.astype(compute_dtype)
    if padded_batch != batch:
        x_in = jnp.pad(x_in, ((0, padded_batch - batch), (0, 0)))

    # --- flatten params (weights in (out,in) layout; biases as (out,1) columns) --
    flat_params = []
    for w, b in params:
        flat_params.append(w.astype(compute_dtype))
        flat_params.append(jnp.reshape(b, (-1, 1)).astype(jnp.float32))

    # --- block specs -------------------------------------------------------------
    in_specs = [pl.BlockSpec((tile_b, in_dim), lambda i: (i, 0))]
    for w, b in params:
        in_specs.append(pl.BlockSpec(w.shape, lambda i: (0, 0)))        # resident
        in_specs.append(pl.BlockSpec((w.shape[0], 1), lambda i: (0, 0)))  # resident
    out_specs = pl.BlockSpec((out_dim, tile_b), lambda i: (0, i))

    # --- advisory cost estimate ---------------------------------------------------
    act_itemsize = jnp.dtype(compute_dtype).itemsize
    flops = 2 * padded_batch * sum(int(w.size) for w, _ in params)
    bytes_accessed = (
        padded_batch * in_dim * act_itemsize            # x read
        + padded_batch * out_dim * 4                    # out write
        + sum(int(w.size) * act_itemsize + int(b.size) * 4 for w, b in params)
    )

    kernel = _make_mlp_kernel(n_linear)

    out_t = pl.pallas_call(
        kernel,
        grid=grid,
        in_specs=in_specs,
        out_specs=out_specs,
        out_shape=jax.ShapeDtypeStruct((out_dim, padded_batch), jnp.float32),
        compiler_params=pltpu.CompilerParams(
            dimension_semantics=("parallel",)),          # megacore on v7x
        cost_estimate=pl.CostEstimate(
            flops=flops, transcendentals=0, bytes_accessed=bytes_accessed),
    )(x_in, *flat_params)

    # (out_dim, padded_batch) -> (batch, out_dim); tiny layout plumbing in the wrapper.
    return out_t.T[:batch]


def init_params(key, layer_sizes, input_dim=5, output_dim=2):
    """Deterministic init mirroring torch.nn.Linear default (uniform +-1/sqrt(fan_in)).

    Weights stored as (out_features, in_features); biases as (out_features,).
    """
    dims = [input_dim] + list(layer_sizes) + [output_dim]
    params = []
    for i in range(len(dims) - 1):
        fan_in, fan_out = dims[i], dims[i + 1]
        key, kw, kb = jax.random.split(key, 3)
        bound = 1.0 / (fan_in ** 0.5)
        w = jax.random.uniform(kw, (fan_out, fan_in), jnp.float32, -bound, bound)
        b = jax.random.uniform(kb, (fan_out,), jnp.float32, -bound, bound)
        params.append((w, b))
    return params


def reference_forward(x, params):
    """Plain-JAX reference of the same MLP (for correctness check)."""
    h = x
    n = len(params)
    for i, (w, b) in enumerate(params):
        h = h @ w.T + b
        if i < n - 1:
            h = jnp.maximum(h, 0.0)
    return h


if __name__ == "__main__":
    key = jax.random.PRNGKey(0)
    key, kx1, kx2 = jax.random.split(key, 3)

    # Small shapes consistent with the module: input_dim=5, output_dim=2.
    layer_sizes = [32, 32]
    params = init_params(key, layer_sizes)

    # 1) Tiny batch (single grid step, full-extent tile).
    x_small = jax.random.normal(kx1, (8, 5), dtype=jnp.float32)
    out_small = jax.block_until_ready(model_waypoint_forward(x_small, params))
    ref_small = reference_forward(x_small, params)
    assert out_small.shape == (8, 2), out_small.shape
    assert jnp.allclose(out_small, ref_small, atol=1e-5, rtol=1e-5), "f32 small mismatch"

    # 2) Non-multiple batch exercising the batch grid + padding (grid=3, TILE_B=128).
    x_big = jax.random.normal(kx2, (300, 5), dtype=jnp.float32)
    out_big = jax.block_until_ready(
        model_waypoint_forward(x_big, params, tile_b=128))
    ref_big = reference_forward(x_big, params)
    assert out_big.shape == (300, 2), out_big.shape
    assert jnp.allclose(out_big, ref_big, atol=1e-5, rtol=1e-5), "f32 grid mismatch"

    # 3) bf16 activation/weight stream (f32 accumulation) -- looser tolerance.
    out_bf16 = jax.block_until_ready(
        model_waypoint_forward(x_small, params, compute_dtype=jnp.bfloat16))
    assert jnp.allclose(out_bf16, ref_small, atol=5e-2, rtol=5e-2), "bf16 mismatch"

    print("KERNEL_OK")
</pallas_src>

<mosaic_0001>
module attributes {stable_mosaic.version = 11 : i64} {
  func.func @kernel(%arg0: i32, %arg1: memref<8x5xf32, #tpu.memory_space<vmem>>, %arg2: memref<32x5xf32, #tpu.memory_space<vmem>>, %arg3: memref<32x1xf32, #tpu.memory_space<vmem>>, %arg4: memref<32x32xf32, #tpu.memory_space<vmem>>, %arg5: memref<32x1xf32, #tpu.memory_space<vmem>>, %arg6: memref<2x32xf32, #tpu.memory_space<vmem>>, %arg7: memref<2x1xf32, #tpu.memory_space<vmem>>, %arg8: memref<2x8xf32, #tpu.memory_space<vmem>>) attributes {dimension_semantics = [#tpu.dimension_semantics<parallel>], iteration_bounds = array<i64: 1>, scalar_prefetch = 0 : i64, scratch_operands = 0 : i64, tpu.core_type = #tpu.core_type<tc>, window_params = [{transform_indices = @transform_0, window_bounds = array<i64: 8, 5>}, {pipeline_mode = #tpu.pipeline_mode<synchronous>, transform_indices = @transform_1, window_bounds = array<i64: 32, 5>}, {pipeline_mode = #tpu.pipeline_mode<synchronous>, transform_indices = @transform_2, window_bounds = array<i64: 32, 1>}, {pipeline_mode = #tpu.pipeline_mode<synchronous>, transform_indices = @transform_3, window_bounds = array<i64: 32, 32>}, {pipeline_mode = #tpu.pipeline_mode<synchronous>, transform_indices = @transform_4, window_bounds = array<i64: 32, 1>}, {pipeline_mode = #tpu.pipeline_mode<synchronous>, transform_indices = @transform_5, window_bounds = array<i64: 2, 32>}, {pipeline_mode = #tpu.pipeline_mode<synchronous>, transform_indices = @transform_6, window_bounds = array<i64: 2, 1>}, {transform_indices = @transform_7, window_bounds = array<i64: 2, 8>}]} {
    %c0 = arith.constant 0 : index
    %c0_0 = arith.constant 0 : index
    %0 = vector.load %arg2[%c0, %c0_0] : memref<32x5xf32, #tpu.memory_space<vmem>>, vector<32x5xf32>
    %c0_1 = arith.constant 0 : index
    %c0_2 = arith.constant 0 : index
    %1 = vector.load %arg3[%c0_1, %c0_2] : memref<32x1xf32, #tpu.memory_space<vmem>>, vector<32x1xf32>
    %c0_3 = arith.constant 0 : index
    %c0_4 = arith.constant 0 : index
    %2 = vector.load %arg1[%c0_3, %c0_4] : memref<8x5xf32, #tpu.memory_space<vmem>>, vector<8x5xf32>
    %cst = arith.constant dense<0.000000e+00> : vector<32x8xf32>
    %3 = tpu.matmul %0, %2, %cst {dimension_numbers = #tpu.dot_dimension_numbers<[1], [1], [0], [0], [0, 0, 1, 0], [], []>} : vector<32x5xf32>, vector<8x5xf32>, vector<32x8xf32> -> vector<32x8xf32>
    %4 = vector.broadcast %1 : vector<32x1xf32> to vector<32x8xf32>
    %5 = arith.addf %3, %4 : vector<32x8xf32>
    %cst_5 = arith.constant 0.000000e+00 : f32
    %6 = vector.broadcast %cst_5 : f32 to vector<32x8xf32>
    %7 = arith.maximumf %5, %6 : vector<32x8xf32>
    %c0_6 = arith.constant 0 : index
    %c0_7 = arith.constant 0 : index
    %8 = vector.load %arg4[%c0_6, %c0_7] : memref<32x32xf32, #tpu.memory_space<vmem>>, vector<32x32xf32>
    %c0_8 = arith.constant 0 : index
    %c0_9 = arith.constant 0 : index
    %9 = vector.load %arg5[%c0_8, %c0_9] : memref<32x1xf32, #tpu.memory_space<vmem>>, vector<32x1xf32>
    %cst_10 = arith.constant dense<0.000000e+00> : vector<32x8xf32>
    %10 = tpu.matmul %8, %7, %cst_10 {dimension_numbers = #tpu.dot_dimension_numbers<[1], [0], [0], [1], [0, 0, 1, 1], [], []>} : vector<32x32xf32>, vector<32x8xf32>, vector<32x8xf32> -> vector<32x8xf32>
    %11 = vector.broadcast %9 : vector<32x1xf32> to vector<32x8xf32>
    %12 = arith.addf %10, %11 : vector<32x8xf32>
    %cst_11 = arith.constant 0.000000e+00 : f32
    %13 = vector.broadcast %cst_11 : f32 to vector<32x8xf32>
    %14 = arith.maximumf %12, %13 : vector<32x8xf32>
    %c0_12 = arith.constant 0 : index
    %c0_13 = arith.constant 0 : index
    %15 = vector.load %arg6[%c0_12, %c0_13] : memref<2x32xf32, #tpu.memory_space<vmem>>, vector<2x32xf32>
    %c0_14 = arith.constant 0 : index
    %c0_15 = arith.constant 0 : index
    %16 = vector.load %arg7[%c0_14, %c0_15] : memref<2x1xf32, #tpu.memory_space<vmem>>, vector<2x1xf32>
    %cst_16 = arith.constant dense<0.000000e+00> : vector<2x8xf32>
    %17 = tpu.matmul %15, %14, %cst_16 {dimension_numbers = #tpu.dot_dimension_numbers<[1], [0], [0], [1], [0, 0, 1, 1], [], []>} : vector<2x32xf32>, vector<32x8xf32>, vector<2x8xf32> -> vector<2x8xf32>
    %18 = vector.broadcast %16 : vector<2x1xf32> to vector<2x8xf32>
    %19 = arith.addf %17, %18 : vector<2x8xf32>
    %c0_17 = arith.constant 0 : index
    %c0_18 = arith.constant 0 : index
    %20 = vector.load %arg8[%c0_17, %c0_18] : memref<2x8xf32, #tpu.memory_space<vmem>>, vector<2x8xf32>
    tpu.vector_store %arg8[%c0_17, %c0_18], %19 {strides = array<i32>} : memref<2x8xf32, #tpu.memory_space<vmem>>, vector<2x8xf32>,
    return
  }
  func.func @transform_0(%arg0: i32) -> (i32, i32) {
    %c0_i32 = arith.constant 0 : i32
    %c0_i32_0 = arith.constant 0 : i32
    return %arg0, %c0_i32 : i32, i32
  }
  func.func @transform_1(%arg0: i32) -> (i32, i32) {
    %c0_i32 = arith.constant 0 : i32
    %c0_i32_0 = arith.constant 0 : i32
    %c0_i32_1 = arith.constant 0 : i32
    return %c0_i32, %c0_i32_0 : i32, i32
  }
  func.func @transform_2(%arg0: i32) -> (i32, i32) {
    %c0_i32 = arith.constant 0 : i32
    %c0_i32_0 = arith.constant 0 : i32
    %c0_i32_1 = arith.constant 0 : i32
    return %c0_i32, %c0_i32_0 : i32, i32
  }
  func.func @transform_3(%arg0: i32) -> (i32, i32) {
    %c0_i32 = arith.constant 0 : i32
    %c0_i32_0 = arith.constant 0 : i32
    %c0_i32_1 = arith.constant 0 : i32
    return %c0_i32, %c0_i32_0 : i32, i32
  }
  func.func @transform_4(%arg0: i32) -> (i32, i32) {
    %c0_i32 = arith.constant 0 : i32
    %c0_i32_0 = arith.constant 0 : i32
    %c0_i32_1 = arith.constant 0 : i32
    return %c0_i32, %c0_i32_0 : i32, i32
  }
  func.func @transform_5(%arg0: i32) -> (i32, i32) {
    %c0_i32 = arith.constant 0 : i32
    %c0_i32_0 = arith.constant 0 : i32
    %c0_i32_1 = arith.constant 0 : i32
    return %c0_i32, %c0_i32_0 : i32, i32
  }
  func.func @transform_6(%arg0: i32) -> (i32, i32) {
    %c0_i32 = arith.constant 0 : i32
    %c0_i32_0 = arith.constant 0 : i32
    %c0_i32_1 = arith.constant 0 : i32
    return %c0_i32, %c0_i32_0 : i32, i32
  }
  func.func @transform_7(%arg0: i32) -> (i32, i32) {
    %c0_i32 = arith.constant 0 : i32
    %c0_i32_0 = arith.constant 0 : i32
    return %c0_i32, %arg0 : i32, i32
  }
}

</mosaic_0001>

<bundles_post_ra>
// kernel: tpu_custom_call.1
= control target key start
LH: loop header
LB: loop body
LE: loop exit
PB: predicated region body
PF: predicated region fallthrough
CT: control target
= control target key end

     0   :  { %vm56_vm0 = vcmask 39936   ;;  %v476_v4 = vmov 0   ;;  %s591_s0 = inlined_call_operand.vmem [shape: f32[8,5], index: 0, kind: input, shape index: {}]   ;;  %s592_s1 = inlined_call_operand.vmem [shape: f32[32,5], index: 1, kind: input, shape index: {}]   ;;  %s593_s2 = inlined_call_operand.vmem [shape: f32[32,1], index: 2, kind: input, shape index: {}]   ;;  %s594_s3 = inlined_call_operand.vmem [shape: f32[32,32], index: 3, kind: input, shape index: {}]   ;;  %s595_s4 = inlined_call_operand.vmem [shape: f32[32,1], index: 4, kind: input, shape index: {}]   ;;  %s596_s5 = inlined_call_operand.vmem [shape: f32[2,32], index: 5, kind: input, shape index: {}]   ;;  %s597_s6 = inlined_call_operand.vmem [shape: f32[2,1], index: 6, kind: input, shape index: {}]   ;;  %s598_s7 = inlined_call_operand.hbm [shape: f32[2,8], index: 7, kind: output, shape index: {}]  }
   0x1   :  { %v35_v0 = vld [vmem:[%s591_s0] sm:$0xff]  ;;  %v34_v2 = vld [vmem:[%s593_s2 + $0x18] sm:$0xff]  ;;  %v28_v3 = vld [vmem:[%s592_s1 + $0x8] sm:$0xff]  ;;  %452 = vset.pattern.permute.xlu0 %v476_v4  ;;  %453 = vset.pattern.permute.xlu1 %v476_v4 }
   0x2   :  { %v27_v1 = vld [vmem:[%s592_s1] sm:$0xff]  ;;  %415 = vmatprep.subr.msk.mxu0 %vm56_vm0, %v35_v0  ;;  %v32_v5 = vld [vmem:[%s593_s2 + $0x8] sm:$0xff]  ;;  %v29_v6 = vld [vmem:[%s592_s1 + $0x10] sm:$0xff]  ;;  %53 = vperm.xlu0 %452, %v34_v2  }
   0x3   :  { %417 = vmatprep.mubr.msk.f32.mxu0 %vm56_vm0, %v27_v1  ;;  %416 = vmatpush3.xpose.msk.msra.mxu0 %vm56_vm0, %v35_v0  ;;  %v33_v7 = vld [vmem:[%s593_s2 + $0x10] sm:$0xff] }
   0x4   :  { %43 = vperm.xlu1 %453, %v32_v5  }
   0x5   :  { %12 = vsyncpa [#allocation3], 0  ;;  %v31_v8 = vld [vmem:[%s593_s2] sm:$0xff]  ;;  %v30_v9 = vld [vmem:[%s592_s1 + $0x18] sm:$0xff]  ;;  %vm189_vm1 = vcmask 261120   ;;  %v477_v35 = vmov 0.0  }
   0x6   :  { %418 = vmatmul.mubr.msk.f32.vlgmr.msra.gmra.mxu0 %vm56_vm0, %v28_v3  ;;  %48 = vperm.xlu0 %452, %v33_v7   ;;  %v168_v10 = vld [vmem:[%s595_s4 + $0x18] sm:$0xff]  ;;  %v167_v11 = vld [vmem:[%s595_s4 + $0x10] sm:$0xff]  ;;  %v166_v12 = vld [vmem:[%s595_s4 + $0x8] sm:$0xff]  ;;  %vm478_vm2 = vmmov 0   ;;  %s479_s9 = smov [#allocation2]   ;;  %vm371_vm3 = vcmask 58368  }
   0x7   :  { %420 = vmatprep.mubr.msk.f32.mxu0 %vm56_vm0, %v29_v6  ;;  %v165_v13 = vld [vmem:[%s595_s4] sm:$0xff]  ;;  %v162_v32 = vld [vmem:[%s594_s3 + $0x8] sm:$0xff]  ;;  %v163_v33 = vld [vmem:[%s594_s3 + $0x10] sm:$0xff]  ;;  %437 = vmatprep.subr.mxu0 %v477_v35  ;;  %s379_s10 = sshll.u32 %s479_s9, 4  ;;  %s380_s10 = int_to_ptr.vmem [resolvable:$true] %s379_s10 }
   0x8   :  { %38 = vperm.xlu1 %453, %v31_v8   ;;  %v292_v14 = vld [vmem:[%s597_s6] sm:$0x3]  ;;  %v164_v34 = vld [vmem:[%s594_s3 + $0x18] sm:$0xff]  ;;  %s454_s11 = scalar_lea.vmem %s380_s10, 32  ;;  %p459_p1 = scmp.lt.s32.totalorder %s380_s10, %s380_s10 }
   0x9   :  { %v161_v15 = vld [vmem:[%s594_s3] sm:$0xff]  ;;  %p455_p0 = scmp.ne.s32.totalorder %s380_s10, %s454_s11  ;;  %p460_p2 = scmp.lt.s32.totalorder %s454_s11, %s454_s11 }
   0xa   :  { %421 = vmatmul.mubr.msk.f32.gmra.mxu0 %vm56_vm0, %v30_v9  ;;  %186 = vperm.xlu0 %452, %v168_v10   ;;  %v291_v52 = vld [vmem:[%s596_s5] sm:$0x3] }
   0xb   :  { %431 = vmatprep.mubr.msk.f32.mxu1 %vm189_vm1, %v161_v15  ;;  %445 = vmatprep.mubr.msk.f32.mxu0 %vm478_vm2, %v477_v35  ;;  %p461_p3 = por %p460_p2, %p459_p1 }
   0xc   :  { %181 = vperm.xlu1 %453, %v167_v11  }
   0xd   :  { %p462_p4 = pnand %p461_p3, %p455_p0 }
   0xe   :  { %176 = vperm.xlu0 %452, %v166_v12  }
  0x10   :  { %171 = vperm.xlu1 %453, %v165_v13  }
  0x12   :  { %295 = vperm.xlu0 %452, %v292_v14  }
  0x7d   :  { %v54_v16 = vpop.permute.xlu0 %53 }
  0x7f   :  { %v44_v18 = vpop.permute.xlu1 %43 }
  0x81   :  { %v49_v22 = vpop.permute.xlu0 %48 }
  0x83   :  { %v39_v27 = vpop.permute.xlu1 %38 }
  0x85   :  { %v187_v36 = vpop.permute.xlu0 %186 }
  0x87   :  { %v182_v38 = vpop.permute.xlu1 %181 }
  0x89   :  { %v177_v42 = vpop.permute.xlu0 %176 }
  0x8b   :  { %v172_v47 = vpop.permute.xlu1 %171 }
  0x8d   :  { %v296_v53 = vpop.permute.xlu0 %295 }
  0xc6   :  { %v419_v17 = vpop.f32.mrf.mxu0 }
  0xc7   :  { %v144_v24 = vadd.f32 %v419_v17, %v44_v18 }
  0xc8   :  { %v138_v19 = vpop.f32.mrf.mxu0 }
  0xc9   :  { %v139_v28 = vadd.f32 %v138_v19, %v39_v27  ;;  %v158_v30 = vmax.f32 %v144_v24, 0.0 }
  0xca   :  { %v422_v20 = vpop.f32.mrf.mxu0 }
  0xcb   :  { %v154_v21 = vadd.f32 %v422_v20, %v54_v16  ;;  %v157_v31 = vmax.f32 %v139_v28, 0.0 }
  0xcc   :  { %v148_v23 = vpop.f32.mrf.mxu0 }
  0xcd   :  { %v160_v25 = vmax.f32 %v154_v21, 0.0  ;;  %v149_v26 = vadd.f32 %v148_v23, %v49_v22 }
  0xcf   :  { %v159_v29 = vmax.f32 %v149_v26, 0.0  ;;  %423 = vmatprep.subr.mxu1 %v160_v25 }
  0xd0   :  { %424 = vmatpush3.msra.mxu1 %v160_v25 }
  0xd1   :  { %425 = vmatprep.subr.mxu1 %v159_v29 }
  0xd2   :  { %426 = vmatpush3.msra.mxu1 %v159_v29 }
  0xd3   :  { %427 = vmatprep.subr.mxu1 %v158_v30 }
  0xd4   :  { %428 = vmatpush3.msra.mxu1 %v158_v30 }
  0xd5   :  { %429 = vmatprep.subr.mxu1 %v157_v31 }
  0xd6   :  { %430 = vmatpush3.msra.mxu1 %v157_v31 }
  0xd7   :  { %432 = vmatmul.mubr.msk.f32.vlgmr.msra.gmra.mxu1 %vm189_vm1, %v162_v32 }
  0xd8   :  { %434 = vmatprep.mubr.msk.f32.mxu1 %vm189_vm1, %v163_v33 }
  0xdb   :  { %435 = vmatmul.mubr.msk.f32.gmra.mxu1 %vm189_vm1, %v164_v34 }
 0x197   :  { %v433_v37 = vpop.f32.mrf.mxu1 }
 0x198   :  { %v274_v44 = vadd.f32 %v433_v37, %v177_v42 }
 0x199   :  { %v268_v39 = vpop.f32.mrf.mxu1 }
 0x19a   :  { %v269_v48 = vadd.f32 %v268_v39, %v172_v47  ;;  %v288_v50 = vmax.f32 %v274_v44, 0.0 }
 0x19b   :  { %v436_v40 = vpop.f32.mrf.mxu1 }
 0x19c   :  { %v284_v41 = vadd.f32 %v436_v40, %v187_v36  ;;  %v287_v51 = vmax.f32 %v269_v48, 0.0 }
 0x19d   :  { %v278_v43 = vpop.f32.mrf.mxu1 }
 0x19e   :  { %v290_v45 = vmax.f32 %v284_v41, 0.0  ;;  %v279_v46 = vadd.f32 %v278_v43, %v182_v38 }
 0x1a0   :  { %v289_v49 = vmax.f32 %v279_v46, 0.0  ;;  %438 = vmatpush3.msra.mxu0 %v290_v45 }
 0x1a1   :  { %439 = vmatprep.subr.mxu0 %v477_v35 }
 0x1a2   :  { %440 = vmatpush3.msra.mxu0 %v289_v49 }
 0x1a3   :  { %441 = vmatprep.subr.mxu0 %v477_v35 }
 0x1a4   :  { %442 = vmatpush3.msra.mxu0 %v288_v50 }
 0x1a5   :  { %443 = vmatprep.subr.mxu0 %v477_v35 }
 0x1a6   :  { %444 = vmatpush3.msra.mxu0 %v287_v51 }
 0x1a7   :  { %446 = vmatmul.mubr.msk.f32.vlgmr.msra.gmra.mxu0 %vm189_vm1, %v291_v52 }
 0x267   :  { %v367_v54 = vpop.f32.mrf.mxu0 }
 0x268   :  { %v368_v55 = vadd.f32 %v367_v54, %v296_v53 }
 0x269   :  { %v447_v56 = vpop.f32.mrf.mxu0 }
 0x26a   :  { %372 = vst.msk [vmem:[#allocation2] sm:$0x3] %vm371_vm3, %v368_v55 }
 0x26b   :  { %465 = shalt.err (!%p462_p4)
}
 0x26c   :  { %382 = dma.vmem_to_hbm [thread:$0]  %s380_s10, 32, %s598_s7, [#allocation3]  }
 0x26d   :  { %474 = dma.done.wait [#allocation3], 32  }
 0x26e   :  { %475 = vsyncadd [#allocation3], 4294967264 }
 0x26f   :  { %386 = vsyncpa [#allocation3], 1 }

</bundles_post_ra>
